<compile_context>
chip_gen: v7x
topology: tpu7x:2x2x1
jax: 0.10.0
libtpu: 0.0.40
codegen_flags: <defaults>
</compile_context>

<pallas_src>
import math

import jax
import jax.numpy as jnp
from jax.experimental import pallas as pl
from jax.experimental.pallas import tpu as pltpu


def _time_lang_emb_kernel(x_ref, aux_ref, o_ref):
    # x_ref:   (tm, g)   f32 -- g consecutive positions folded per output row
    # aux_ref: (g+1, L)  f32 -- rows 0..g-1: lane-masked duplicated inv_freq
    #                           (disjoint masks, one nonzero term per lane)
    #                           row  g    : phase row (0 / -pi/2 interleaved)
    # o_ref:   (tm, L)   f32 -- L = g*dim, interleaved [cos, sin, cos, sin, ...]
    x = x_ref[...]                      # (tm, g)
    aux = aux_ref[...]                  # (g+1, L)
    g = x.shape[1]

    # ang[t, l] = x[t, l//dim] * inv_freq[(l%dim)//2]  (exact: masks are 0/1
    # and disjoint, so exactly one term per lane is nonzero).
    ang = x[:, 0:1] * aux[0:1, :]       # (tm,1)*(1,L) -> (tm,L)
    for j in range(1, g):
        ang = ang + x[:, j:j + 1] * aux[j:j + 1, :]
    # even lane -> cos(a); odd lane -> cos(a - pi/2) == sin(a)
    ang = ang + aux[g:g + 1, :]
    o_ref[...] = jnp.cos(ang)           # single EUP transcendental per element


def time_lang_embedding(x, dim, *, tm=None):
    """Pallas equivalent of TimeLangEmbedding(dim).forward(x)."""
    assert dim % 2 == 0, "TimeLangEmbedding requires an even dim"
    shape = x.shape
    x_flat = x.reshape(-1).astype(jnp.float32)
    n = x_flat.shape[0]

    # Lane-dense fold factor: pack g consecutive positions per output row so
    # the kernel's output minor dim is a multiple of 128 lanes.
    g = (128 // dim) if (dim < 128 and 128 % dim == 0) else 1
    L = g * dim

    # Constant aux rows (built once in the wrapper, resident across the grid).
    inv_freq = jnp.exp(
        jnp.arange(0, dim, 2, dtype=jnp.float32) * (-math.log(10000.0) / dim))
    lane = jnp.arange(L, dtype=jnp.int32)
    invf_rep = inv_freq[(lane % dim) // 2]                        # (L,)
    grp = lane // dim                                             # position-in-row
    freq_rows = jnp.where(
        grp[None, :] == jnp.arange(g, dtype=jnp.int32)[:, None],
        invf_rep[None, :], jnp.float32(0.0))                      # (g, L)
    phase_row = jnp.where((lane % 2) == 1,
                          jnp.float32(-math.pi / 2),
                          jnp.float32(0.0))[None, :]              # (1, L)
    aux = jnp.concatenate([freq_rows, phase_row], axis=0).astype(jnp.float32)

    # Row tiling: big tiles amortize per-grid-step overhead; ~2 MiB of output
    # per block keeps double-buffered blocks well inside every chip's scoped
    # VMEM default (v5e 16 MiB, v6e/v7x 32 MiB).
    n_rows = pl.cdiv(n, g)
    if tm is None:
        tm = max(8, ((2 * 1024 * 1024) // (L * 4)) // 8 * 8)
        tm = min(tm, 2048)
    tm = max(8, (tm // 8) * 8)
    tm = min(tm, ((n_rows + 7) // 8) * 8)     # don't over-pad tiny inputs
    n_rows_pad = pl.cdiv(n_rows, tm) * tm
    n_pad = n_rows_pad * g

    x2d = (jnp.zeros((n_pad,), jnp.float32)
           .at[:n].set(x_flat)
           .reshape(n_rows_pad, g))

    out = pl.pallas_call(
        _time_lang_emb_kernel,
        out_shape=jax.ShapeDtypeStruct((n_rows_pad, L), jnp.float32),
        grid_spec=pltpu.PrefetchScalarGridSpec(
            num_scalar_prefetch=0,
            grid=(n_rows_pad // tm,),
            in_specs=[
                pl.BlockSpec((tm, g), lambda i: (i, 0)),
                pl.BlockSpec((g + 1, L), lambda i: (0, 0)),   # resident consts
            ],
            out_specs=pl.BlockSpec((tm, L), lambda i: (i, 0)),
        ),
        compiler_params=pltpu.CompilerParams(
            dimension_semantics=("parallel",),   # megacore / v7x TC sharding
        ),
    )(x2d, aux)

    # (n_rows_pad, g*dim) and (n_pad, dim) are the same row-major bytes.
    return out.reshape(n_pad, dim)[:n].reshape(*shape, dim)


def _reference(x, dim):
    """Pure-JAX reference mirroring the PyTorch forward."""
    inv_freq = jnp.exp(
        jnp.arange(0, dim, 2, dtype=jnp.float32) * (-math.log(10000.0) / dim))
    sinusoid = jnp.outer(x.reshape(-1).astype(jnp.float32), inv_freq)
    pos = jnp.stack([jnp.cos(sinusoid), jnp.sin(sinusoid)], axis=-1)
    return pos.reshape(*x.shape, dim)


if __name__ == "__main__":
    key = jax.random.PRNGKey(0)
    B, S = 2, 8
    # "positions" — arbitrary float timesteps / token indices
    x = jax.random.uniform(key, (B, S), dtype=jnp.float32,
                           minval=0.0, maxval=100.0)

    # dim < 128: exercises the lane-dense g-fold path (g = 128 // 32 = 4).
    dim = 32
    out = jax.block_until_ready(time_lang_embedding(x, dim))
    ref = _reference(x, dim)
    assert out.shape == (B, S, dim), out.shape
    # cos(a - fl(pi/2)) vs sin(a): same math, but the f32 phase subtraction at
    # |a| ~ 100 rounds by up to ~4e-6 absolute; 5e-5 is a comfortable bound.
    err = float(jnp.max(jnp.abs(out - ref)))
    assert err < 5e-5, err

    # dim >= 128: exercises the unfolded (g = 1) path.
    dim2 = 256
    out2 = jax.block_until_ready(time_lang_embedding(x, dim2))
    ref2 = _reference(x, dim2)
    assert out2.shape == (B, S, dim2), out2.shape
    err2 = float(jnp.max(jnp.abs(out2 - ref2)))
    assert err2 < 5e-5, err2

    print("KERNEL_OK")
</pallas_src>

<mosaic_0001>
module attributes {stable_mosaic.version = 11 : i64} {
  func.func @_time_lang_emb_kernel(%arg0: i32, %arg1: memref<8x4xf32, #tpu.memory_space<vmem>>, %arg2: memref<5x128xf32, #tpu.memory_space<vmem>>, %arg3: memref<8x128xf32, #tpu.memory_space<vmem>>) attributes {dimension_semantics = [#tpu.dimension_semantics<parallel>], iteration_bounds = array<i64: 1>, scalar_prefetch = 0 : i64, scratch_operands = 0 : i64, tpu.core_type = #tpu.core_type<tc>, window_params = [{transform_indices = @transform_0, window_bounds = array<i64: 8, 4>}, {pipeline_mode = #tpu.pipeline_mode<synchronous>, transform_indices = @transform_1, window_bounds = array<i64: 5, 128>}, {transform_indices = @transform_2, window_bounds = array<i64: 8, 128>}]} {
    %c0 = arith.constant 0 : index
    %c0_0 = arith.constant 0 : index
    %0 = vector.load %arg1[%c0, %c0_0] : memref<8x4xf32, #tpu.memory_space<vmem>>, vector<8x4xf32>
    %c0_1 = arith.constant 0 : index
    %c0_2 = arith.constant 0 : index
    %1 = vector.load %arg2[%c0_1, %c0_2] : memref<5x128xf32, #tpu.memory_space<vmem>>, vector<5x128xf32>
    %2 = vector.extract_strided_slice %0 {offsets = [0, 0], sizes = [8, 1], strides = [1, 1]} : vector<8x4xf32> to vector<8x1xf32>
    %3 = vector.extract_strided_slice %1 {offsets = [0, 0], sizes = [1, 128], strides = [1, 1]} : vector<5x128xf32> to vector<1x128xf32>
    %4 = vector.broadcast %2 : vector<8x1xf32> to vector<8x128xf32>
    %5 = vector.broadcast %3 : vector<1x128xf32> to vector<8x128xf32>
    %6 = arith.mulf %4, %5 : vector<8x128xf32>
    %7 = vector.extract_strided_slice %0 {offsets = [0, 1], sizes = [8, 1], strides = [1, 1]} : vector<8x4xf32> to vector<8x1xf32>
    %8 = vector.extract_strided_slice %1 {offsets = [1, 0], sizes = [1, 128], strides = [1, 1]} : vector<5x128xf32> to vector<1x128xf32>
    %9 = vector.broadcast %7 : vector<8x1xf32> to vector<8x128xf32>
    %10 = vector.broadcast %8 : vector<1x128xf32> to vector<8x128xf32>
    %11 = arith.mulf %9, %10 : vector<8x128xf32>
    %12 = arith.addf %6, %11 : vector<8x128xf32>
    %13 = vector.extract_strided_slice %0 {offsets = [0, 2], sizes = [8, 1], strides = [1, 1]} : vector<8x4xf32> to vector<8x1xf32>
    %14 = vector.extract_strided_slice %1 {offsets = [2, 0], sizes = [1, 128], strides = [1, 1]} : vector<5x128xf32> to vector<1x128xf32>
    %15 = vector.broadcast %13 : vector<8x1xf32> to vector<8x128xf32>
    %16 = vector.broadcast %14 : vector<1x128xf32> to vector<8x128xf32>
    %17 = arith.mulf %15, %16 : vector<8x128xf32>
    %18 = arith.addf %12, %17 : vector<8x128xf32>
    %19 = vector.extract_strided_slice %0 {offsets = [0, 3], sizes = [8, 1], strides = [1, 1]} : vector<8x4xf32> to vector<8x1xf32>
    %20 = vector.extract_strided_slice %1 {offsets = [3, 0], sizes = [1, 128], strides = [1, 1]} : vector<5x128xf32> to vector<1x128xf32>
    %21 = vector.broadcast %19 : vector<8x1xf32> to vector<8x128xf32>
    %22 = vector.broadcast %20 : vector<1x128xf32> to vector<8x128xf32>
    %23 = arith.mulf %21, %22 : vector<8x128xf32>
    %24 = arith.addf %18, %23 : vector<8x128xf32>
    %25 = vector.extract_strided_slice %1 {offsets = [4, 0], sizes = [1, 128], strides = [1, 1]} : vector<5x128xf32> to vector<1x128xf32>
    %26 = vector.broadcast %25 : vector<1x128xf32> to vector<8x128xf32>
    %27 = arith.addf %24, %26 : vector<8x128xf32>
    %28 = math.cos %27 : vector<8x128xf32>
    %c0_3 = arith.constant 0 : index
    %c0_4 = arith.constant 0 : index
    %29 = vector.load %arg3[%c0_3, %c0_4] : memref<8x128xf32, #tpu.memory_space<vmem>>, vector<8x128xf32>
    tpu.vector_store %arg3[%c0_3, %c0_4], %28 {strides = array<i32>} : memref<8x128xf32, #tpu.memory_space<vmem>>, vector<8x128xf32>,
    return
  }
  func.func @transform_0(%arg0: i32) -> (i32, i32) {
    %c0_i32 = arith.constant 0 : i32
    %c0_i32_0 = arith.constant 0 : i32
    return %arg0, %c0_i32 : i32, i32
  }
  func.func @transform_1(%arg0: i32) -> (i32, i32) {
    %c0_i32 = arith.constant 0 : i32
    %c0_i32_0 = arith.constant 0 : i32
    %c0_i32_1 = arith.constant 0 : i32
    return %c0_i32, %c0_i32_0 : i32, i32
  }
  func.func @transform_2(%arg0: i32) -> (i32, i32) {
    %c0_i32 = arith.constant 0 : i32
    %c0_i32_0 = arith.constant 0 : i32
    return %arg0, %c0_i32 : i32, i32
  }
}

</mosaic_0001>

<bundles_post_ra>
// kernel: tpu_custom_call.1
= control target key start
LH: loop header
LB: loop body
LE: loop exit
PB: predicated region body
PF: predicated region fallthrough
CT: control target
= control target key end

     0   :  { %v229_v1 = vmov 0   ;;  %v230_v2 = vmov 2   ;;  %s294_s0 = inlined_call_operand.vmem [shape: f32[8,4], index: 0, kind: input, shape index: {}]   ;;  %s295_s1 = inlined_call_operand.vmem [shape: f32[5,128], index: 1, kind: input, shape index: {}]   ;;  %s296_s2 = inlined_call_operand.hbm [shape: f32[8,128], index: 2, kind: output, shape index: {}]  }
   0x1   :  { %v12_v0 = vld [vmem:[%s294_s0] sm:$0xff]  ;;  %196 = vset.pattern.permute.xlu0 %v229_v1  ;;  %198 = vset.pattern.permute.xlu1 %v230_v2 }
   0x2   :  { %7 = vsyncpa [#allocation3], 0  ;;  %16 = vperm.xlu0 %196, %v12_v0   ;;  %35 = vperm.xlu1 %198, %v12_v0   ;;  %v231_v3 = vmov 1   ;;  %v232_v4 = vmov 3   ;;  %v19_v5 = vlaneseq  ;;  %v13_v9 = vld [vmem:[%s295_s1] sm:$0x1f] }
   0x3   :  { %v233_v40 = vmov 683565275   ;;  %v234_v42 = vmov 2475754826   ;;  %v235_v45 = vmov 2131351028  }
   0x4   :  { %v20_v6 = vshrl.u32 %v19_v5, 7  ;;  %v236_v48 = vmov 2102212464   ;;  %v237_v51 = vmov 920167782   ;;  %s239_s1 = smov [#allocation2]  }
   0x5   :  { %v238_v54 = vmov 1326507024   ;;  %s169_s12 = sshll.u32 %s239_s1, 4  ;;  %s170_s12 = int_to_ptr.vmem [resolvable:$true] %s169_s12 }
   0x6   :  { %197 = vset.pattern.permute.xlu0 %v231_v3  ;;  %199 = vset.pattern.permute.xlu1 %v232_v4  ;;  %v21_v7 = vsub.s32 0, %v20_v6  ;;  %v30_v8 = vsub.s32 1, %v20_v6  ;;  %v40_v11 = vsub.s32 2, %v20_v6  ;;  %v50_v13 = vsub.s32 3, %v20_v6  ;;  %s205_s13 = scalar_lea.vmem %s170_s12, 128  ;;  %p210_p1 = scmp.lt.s32.totalorder %s170_s12, %s170_s12 }
   0x7   :  { %25 = vperm.xlu0 %197, %v12_v0   ;;  %45 = vperm.xlu1 %199, %v12_v0   ;;  %v56_v22 = vsub.s32 4, %v20_v6  ;;  %p206_p0 = scmp.ne.s32.totalorder %s170_s12, %s205_s13  ;;  %p211_p2 = scmp.lt.s32.totalorder %s205_s13, %s205_s13 }
   0x8   :  { %v22_v14 = vrot.slane %v13_v9, %v21_v7  ;;  %v31_v15 = vrot.slane %v13_v9, %v30_v8  ;;  %v41_v16 = vrot.slane %v13_v9, %v40_v11  ;;  %v51_v17 = vrot.slane %v13_v9, %v50_v13 }
   0x9   :  { %v57_v26 = vrot.slane %v13_v9, %v56_v22  ;;  %p212_p3 = por %p211_p2, %p210_p1 }
   0xb   :  { %200 = vset.pattern.permute.xlu0 %v232_v4  ;;  %p213_p4 = pnand %p212_p3, %p206_p0 }
  0x81   :  { %v17_v10 = vpop.permute.xlu0 %16  ;;  %v36_v12 = vpop.permute.xlu1 %35 }
  0x82   :  { %v23_v20 = vmul.f32 %v22_v14, %v17_v10  ;;  %v42_v23 = vmul.f32 %v41_v16, %v36_v12 }
  0x86   :  { %v26_v18 = vpop.permute.xlu0 %25  ;;  %v46_v19 = vpop.permute.xlu1 %45 }
  0x87   :  { %v32_v21 = vmul.f32 %v31_v15, %v26_v18  ;;  %v52_v25 = vmul.f32 %v51_v17, %v46_v19 }
  0x89   :  { %v33_v24 = vadd.f32 %v32_v21, %v23_v20 }
  0x8b   :  { %v43_v27 = vadd.f32 %v42_v23, %v33_v24 }
  0x8d   :  { %v53_v28 = vadd.f32 %v52_v25, %v43_v27 }
  0x8f   :  { %v261_v29 = vadd.f32 %v57_v26, %v53_v28 }
  0x91   :  { %v62_v30 = vand.u32 2139095040, %v261_v29  ;;  %v59_v34 = vand.u32 2147483647, %v261_v29  ;;  %vm61_vm7 = vcmp.lt.s32.totalorder %v261_v29, 0  ;;  %vm151_vm12 = vweird.f32 %v261_v29 }
  0x93   :  { %v63_v31 = vshrl.u32 %v62_v30, 23  ;;  %v66_v38 = vand.u32 8388607, %v59_v34  ;;  %vm60_vm8 = vcmp.le.f32.partialorder %v59_v34, 0.7853982 }
  0x95   :  { %v177_v32 = vadd.s32 4294967169, %v63_v31  ;;  %v67_v56 = vor.u32 8388608, %v66_v38 }
  0x97   :  { %v69_v33 = vadd.s32 1, %v177_v32  ;;  %v107_v6 = vshll.u32 %v67_v56, 8 }
  0x99   :  { %vm70_vm0 = vcmp.gt.s32.totalorder %v69_v33, 0 }
  0x9a   :  { %v71_v35 = vsel %vm70_vm0, %v69_v33, 0 }
  0x9b   :  { %v73_v36 = vand.u32 31, %v71_v35  ;;  %v72_v39 = vshrl.u32 %v71_v35, 5 }
  0x9d   :  { %v74_v37 = vsub.s32 32, %v73_v36  ;;  %v76_v41 = vshll.u32 %v233_v40, %v73_v36  ;;  %v79_v43 = vshll.u32 %v234_v42, %v73_v36  ;;  %v82_v47 = vshll.u32 %v235_v45, %v73_v36 }
  0x9e   :  { %v85_v50 = vshll.u32 %v236_v48, %v73_v36  ;;  %v88_v53 = vshll.u32 %v237_v51, %v73_v36  ;;  %vm91_vm1 = vcmp.lt.s32.totalorder %v72_v39, 1  ;;  %vm94_vm2 = vcmp.lt.s32.totalorder %v72_v39, 4 }
  0x9f   :  { %v77_v44 = vshrl.u32 %v234_v42, %v74_v37  ;;  %v80_v46 = vshrl.u32 %v235_v45, %v74_v37  ;;  %v83_v49 = vshrl.u32 %v236_v48, %v74_v37  ;;  %v86_v52 = vshrl.u32 %v237_v51, %v74_v37 }
  0xa0   :  { %v89_v55 = vshrl.u32 %v238_v54, %v74_v37  ;;  %v75_v1 = vshrl.u32 %v233_v40, %v74_v37  ;;  %vm93_vm3 = vcmp.lt.s32.totalorder %v72_v39, 3  ;;  %vm92_vm4 = vcmp.lt.s32.totalorder %v72_v39, 2 }
  0xa1   :  { %v78_v57 = vor.u32 %v77_v44, %v76_v41  ;;  %v81_v58 = vor.u32 %v80_v46, %v79_v43  ;;  %v84_v59 = vor.u32 %v83_v49, %v82_v47  ;;  %v87_v60 = vor.u32 %v86_v52, %v85_v50 }
  0xa2   :  { %v90_v61 = vor.u32 %v89_v55, %v88_v53 }
  0xa3   :  { %v96_v62 = vsel %vm94_vm2, %v84_v59, 2102212464  ;;  %v99_v63 = vsel %vm91_vm1, %v78_v57, %v81_v58  ;;  %v103_v0 = vsel %vm91_vm1, %v81_v58, %v84_v59  ;;  %v100_v2 = vsel %vm94_vm2, %v87_v60, 920167782 }
  0xa4   :  { %v104_v3 = vsel %vm94_vm2, %v90_v61, 1326507024  ;;  %v101_v4 = vsel %vm93_vm3, %v84_v59, %v100_v2  ;;  %v95_v7 = vsel %vm91_vm1, %v75_v1, %v78_v57  ;;  %v97_v8 = vsel %vm93_vm3, %v81_v58, %v96_v62 }
  0xa5   :  { %v105_v5 = vsel %vm93_vm3, %v87_v60, %v104_v3  ;;  %v102_v9 = vsel %vm92_vm4, %v99_v63, %v101_v4  ;;  %v98_v15 = vsel %vm92_vm4, %v95_v7, %v97_v8 }
  0xa6   :  { %v106_v10 = vsel %vm92_vm4, %v103_v0, %v105_v5  ;;  %v270_v13 = vmul.u32.u64.low %v107_v6, %v102_v9  ;;  %v271_v14 = vmul.u32.u64.high %v107_v6, %v102_v9, %v270_v13  ;;  %v114_v17 = vmul.u32 %v107_v6, %v98_v15 }
  0xa7   :  { %v267_v11 = vmul.u32.u64.low %v107_v6, %v106_v10  ;;  %v268_v12 = vmul.u32.u64.high %v107_v6, %v106_v10, %v267_v11 }
  0xa8   :  { %v117_v16 = vadd.s32 1, %v271_v14 }
  0xa9   :  { %vm116_vm5 = vc.u32 %v268_v12, %v270_v13  ;;  %v115_v30 = vadd.s32 %v270_v13, %v268_v12 }
  0xaa   :  { %v118_v18 = vsel %vm116_vm5, %v117_v16, %v271_v14 }
  0xab   :  { %v119_v19 = vadd.s32 %v118_v18, %v114_v17 }
  0xad   :  { %v120_v20 = vadd.s32 536870912, %v119_v19 }
  0xaf   :  { %v121_v21 = vshrl.u32 %v120_v20, 30 }
  0xb1   :  { %v122_v22 = vshll.u32 %v121_v21, 30  ;;  %v145_v45 = vsub.s32 4, %v121_v21 }
  0xb3   :  { %v123_v23 = vsub.s32 %v119_v19, %v122_v22  ;;  %v146_v47 = vsel %vm61_vm7, %v145_v45, %v121_v21 }
  0xb4   :  { %v148_v48 = vsel %vm60_vm8, 0, %v146_v47 }
  0xb5   :  { %v125_v24 = vsub.s32 0, %v123_v23  ;;  %v152_v49 = vand.u32 3, %v148_v48 }
  0xb7   :  { %v178_v25 = vmin.u32 %v125_v24, %v123_v23  ;;  %vm157_vm9 = vcmp.eq.s32.totalorder %v152_v49, 2  ;;  %vm154_vm10 = vcmp.eq.s32.totalorder %v152_v49, 0  ;;  %vm153_vm11 = vcmp.lt.s32.totalorder %v152_v49, 2 }
  0xb9   :  { %v127_v26 = vclz %v178_v25 }
  0xbb   :  { %v179_v27 = vadd.s32 4294967294, %v127_v26 }
  0xbd   :  { %vm180_vm6 = vcmp.lt.s32.totalorder %v179_v27, 0 }
  0xbe   :  { %v130_v28 = vsel %vm180_vm6, 0, %v179_v27 }
  0xbf   :  { %v131_v31 = vsub.s32 32, %v130_v28  ;;  %v135_v32 = vsub.s32 4294967266, %v130_v28  ;;  %v132_v33 = vshll.u32 %v123_v23, %v130_v28 }
  0xc1   :  { %v133_v35 = vshrl.u32 %v115_v30, %v131_v31  ;;  %v136_v36 = vadd.s32 127, %v135_v32 }
  0xc3   :  { %v134_v37 = vor.u32 %v133_v35, %v132_v33  ;;  %v137_v38 = vshll.u32 %v136_v36, 23 }
  0xc5   :  { %v138_v39 = vor.u32 4788187, %v137_v38  ;;  %v141_v41 = vcvt.s32.f32 %v134_v37 }
  0xc7   :  { %v139_v40 = vand.u32 2147483647, %v138_v39 }
  0xc9   :  { %v142_v42 = vmul.f32 %v141_v41, %v139_v40 }
  0xcb   :  { %v143_v43 = vxor.u32 2147483648, %v142_v42 }
  0xcd   :  { %v144_v44 = vsel %vm61_vm7, %v143_v43, %v142_v42 }
  0xce   :  { %v147_v46 = vsel %vm60_vm8, %v261_v29, %v144_v44 }
  0xcf   :  { %201 = vcosq.f32 %v147_v46 }
  0xd0   :  { %203 = vsinq.f32 %v147_v46 }
  0xd9   :  { %v202_v50 = vpop.eup %201 }
  0xda   :  { %v204_v51 = vpop.eup %203  ;;  %v158_v52 = vxor.u32 2147483648, %v202_v50 }
  0xdb   :  { %v155_v53 = vxor.u32 2147483648, %v204_v51 }
  0xdc   :  { %v159_v54 = vsel %vm157_vm9, %v158_v52, %v204_v51 }
  0xdd   :  { %v156_v34 = vsel %vm154_vm10, %v202_v50, %v155_v53 }
  0xde   :  { %v160_v55 = vsel %vm153_vm11, %v156_v34, %v159_v54 }
  0xdf   :  { %v161_v56 = vsel %vm151_vm12, nan, %v160_v55 }
  0xe0   :  { %162 = vst [vmem:[#allocation2] sm:$0xff] %v161_v56 }
  0xe1   :  { %216 = shalt.err (!%p213_p4)
}
  0xe2   :  { %s217_s16 = scalar_lea.hbm %s296_s2, 128 }
  0xe3   :  { %p218_p5 = scmp.ne.s32.totalorder %s296_s2, %s217_s16  ;;  %p221_p6 = scmp.lt.u32.totalorder %s217_s16, %s296_s2 }
  0xe5   :  { %p223_p7 = pnand %p221_p6, %p218_p5 }
  0xe7   :  { %226 = shalt.err (!%p223_p7)
}
  0xe8   :  { %172 = dma.vmem_to_hbm [thread:$0]  %s170_s12, 128, %s296_s2, [#allocation3]  }
  0xe9   :  { %227 = dma.done.wait [#allocation3], 128  }
  0xea   :  { %228 = vsyncadd [#allocation3], 4294967168 }
  0xeb   :  { %176 = vsyncpa [#allocation3], 1 }

</bundles_post_ra>
